<compile_context>
chip_gen: v7x
topology: tpu7x:2x2x1
jax: 0.10.0
libtpu: 0.0.40
codegen_flags: <defaults>
</compile_context>

<pallas_src>
import numpy as np
import jax
import jax.numpy as jnp
from jax.experimental import pallas as pl
from jax.experimental.pallas import tpu as pltpu

# ----------------------------- configuration -------------------------------
B = 2                      # batch
C_IN = 3                   # image channels (pixel_mean / pixel_std have 3 entries)
H = W = 32                 # padded image size (divisible by size_divisibility = 32)
STRIDE = 4                 # synthetic backbone downsampling
FH, FW = H // STRIDE, W // STRIDE
S = FH * FW                # flattened low-res spatial (64)
HW = H * W                 # flattened full-res spatial (1024)
D = 32                     # hidden / mask-embedding dim
Q = 8                      # num_queries
NUM_CLASSES = 16           # sem_seg_head.num_classes (logits have NUM_CLASSES + 1)
K1 = NUM_CLASSES + 1

PIXEL_MEAN = (123.675, 116.28, 103.53)
PIXEL_STD = (58.395, 57.12, 57.375)


# --------------------------- constant matrices ------------------------------
def build_interp_matrix(out_size, in_size):
    """Weights matching F.interpolate(mode='bilinear', align_corners=False)."""
    A = np.zeros((out_size, in_size), dtype=np.float32)
    scale = in_size / out_size
    for i in range(out_size):
        src = max(scale * (i + 0.5) - 0.5, 0.0)
        x0 = min(int(np.floor(src)), in_size - 1)
        x1 = min(x0 + 1, in_size - 1)
        l1 = src - x0
        A[i, x0] += 1.0 - l1
        A[i, x1] += l1
    return A


def build_pool_matrix():
    """(H*W, FH*FW) matrix implementing the 4x4 mean pool as one matmul."""
    P = np.zeros((HW, S), dtype=np.float32)
    inv = 1.0 / (STRIDE * STRIDE)
    for h in range(H):
        for w in range(W):
            P[h * W + w, (h // STRIDE) * FW + (w // STRIDE)] = inv
    return jnp.asarray(P)


def build_upsample_matrix():
    """(FH*FW, H*W) Kronecker matrix: bilinear align_corners=False upsample."""
    A = build_interp_matrix(H, FH)        # (H, FH)
    Bw = build_interp_matrix(W, FW)       # (W, FW)
    UP = np.einsum("Hh,Ww->hwHW", A, Bw).reshape(S, HW)
    return jnp.asarray(np.ascontiguousarray(UP))


# ------------------------------ fused kernel --------------------------------
def _maskformer_kernel(img_ref, pool_ref, up_ref, wt_ref, bb_ref,
                       q_ref, cw_ref, cb_ref, mw_ref, mb_ref, o_ref):
    # img_ref: (1, C_IN, HW)   raw image for this batch element
    # pool_ref: (HW, S)        4x4 mean-pool matrix
    # up_ref:   (S, HW)        bilinear upsample Kronecker matrix
    # wt_ref:   (D, C_IN)      backbone 1x1-conv weight, normalization folded, transposed
    # bb_ref:   (D, 1)         backbone bias, normalization folded
    # q_ref:    (Q, D)         query embeddings
    # cw/cb:    (D, K1)/(1,K1) class head
    # mw/mb:    (D, D)/(1, D)  mask-embedding head
    # o_ref:    (1, NUM_CLASSES, HW)
    img = img_ref[0]                                                    # (C_IN, HW)

    # 1) 4x4 mean pool of the raw image as one MXU matmul (K = HW).
    pooled = jnp.dot(img, pool_ref[...],
                     preferred_element_type=jnp.float32)                # (C_IN, S)

    # 2) backbone 1x1 conv with (x - mean)/std folded into the weights;
    #    K = C_IN = 3 contraction done as 3 broadcast FMAs on the VPU.
    feat = bb_ref[...]                                                  # (D, 1)
    wt = wt_ref[...]                                                    # (D, C_IN)
    for c in range(C_IN):
        feat = feat + wt[:, c:c + 1] * pooled[c:c + 1, :]               # (D, S)

    # 3) class head + softmax over classes, drop the "no-object" class.
    queries = q_ref[...]                                                # (Q, D)
    logits = jnp.dot(queries, cw_ref[...],
                     preferred_element_type=jnp.float32) + cb_ref[...]  # (Q, K1)
    mx = jnp.max(logits, axis=-1, keepdims=True)
    e = jnp.exp(logits - mx)
    p = e[:, :NUM_CLASSES] / jnp.sum(e, axis=-1, keepdims=True)         # (Q, K)

    # 4) mask-embedding head and per-query low-res masks.
    mask_embed = jnp.dot(queries, mw_ref[...],
                         preferred_element_type=jnp.float32) + mb_ref[...]  # (Q, D)
    masks_lo = jnp.dot(mask_embed, feat,
                       preferred_element_type=jnp.float32)              # (Q, S)

    # 5) F.interpolate(bilinear, align_corners=False) as a single Kronecker
    #    matmul -> lane-dense (Q, HW) intermediate, stays in VMEM.
    masks_hi = jnp.dot(masks_lo, up_ref[...],
                       preferred_element_type=jnp.float32)              # (Q, HW)

    # 6) semantic_inference: sigmoid masks, einsum 'qc,qhw->chw'.
    sig = jax.nn.sigmoid(masks_hi)                                      # (Q, HW)
    o_ref[0] = jnp.einsum("qc,qs->cs", p, sig,
                          preferred_element_type=jnp.float32)           # (K, HW)


# ------------------------------ fused wrapper --------------------------------
@jax.jit
def _maskformer_fused(images, params, pool_mat, up_mat):
    """images: (B, C_IN, H, W) -> sem_seg (B, NUM_CLASSES, H, W)."""
    # Affine fold of the pixel normalization into the backbone 1x1 conv:
    #   (x - mean)/std @ w + b  ==  x @ (w/std) + (b - mean @ (w/std))
    mean = jnp.asarray(PIXEL_MEAN, jnp.float32)
    std = jnp.asarray(PIXEL_STD, jnp.float32)
    w_fold = params["backbone_w"] / std[:, None]                        # (C_IN, D)
    b_fold = params["backbone_b"] - mean @ w_fold                       # (D,)

    img3 = images.astype(jnp.float32).reshape(B, C_IN, HW)

    grid = (B,)
    full = lambda b: (0, 0)
    out = pl.pallas_call(
        _maskformer_kernel,
        grid=grid,
        in_specs=[
            pl.BlockSpec((1, C_IN, HW), lambda b: (b, 0, 0)),   # image (per-b)
            pl.BlockSpec((HW, S), full),                        # pool matrix
            pl.BlockSpec((S, HW), full),                        # upsample matrix
            pl.BlockSpec((D, C_IN), full),                      # folded conv weight^T
            pl.BlockSpec((D, 1), full),                         # folded conv bias
            pl.BlockSpec((Q, D), full),                         # query embeddings
            pl.BlockSpec((D, K1), full),                        # class_w
            pl.BlockSpec((1, K1), full),                        # class_b
            pl.BlockSpec((D, D), full),                         # mask_w
            pl.BlockSpec((1, D), full),                         # mask_b
        ],
        out_specs=pl.BlockSpec((1, NUM_CLASSES, HW), lambda b: (b, 0, 0)),
        out_shape=jax.ShapeDtypeStruct((B, NUM_CLASSES, HW), jnp.float32),
        compiler_params=pltpu.CompilerParams(
            dimension_semantics=("parallel",)),                 # v7x: one b per TC
    )(img3, pool_mat, up_mat,
      w_fold.T, b_fold[:, None],
      params["query_embed"],
      params["class_w"], params["class_b"][None, :],
      params["mask_w"], params["mask_b"][None, :])
    return out.reshape(B, NUM_CLASSES, H, W)


def maskformer_forward(images, params, pool_mat, up_mat):
    """Inference path of MaskFormer.forward. images: (B, C, H, W)."""
    # ImageList.from_tensors: H, W already divisible by size_divisibility=32,
    # so padding is a no-op; sem_seg_postprocess is identity here since
    # image_size == (height, width) == (H, W).
    sem = _maskformer_fused(images, params, pool_mat, up_mat)
    # TODO(synk): panoptic_inference uses data-dependent Python control flow
    # (.item(), dict bookkeeping) with no clean Pallas equivalent; panoptic_on=False.
    return [{"sem_seg": sem[b]} for b in range(B)]


# ------------------------------ pure-JAX reference --------------------------
def reference_forward(images, params):
    mean = jnp.asarray(PIXEL_MEAN, jnp.float32)[None, :, None, None]
    std = jnp.asarray(PIXEL_STD, jnp.float32)[None, :, None, None]
    x = (images.astype(jnp.float32) - mean) / std
    pooled = x.reshape(B, C_IN, FH, STRIDE, FW, STRIDE).mean(axis=(3, 5))
    flat = pooled.transpose(0, 2, 3, 1).reshape(B * FH * FW, C_IN)
    feat = (flat @ params["backbone_w"] + params["backbone_b"]).reshape(
        B, FH, FW, D).transpose(0, 3, 1, 2)
    logits = params["query_embed"] @ params["class_w"] + params["class_b"]
    mask_embed = params["query_embed"] @ params["mask_w"] + params["mask_b"]
    pred_masks = jnp.einsum("qd,bdhw->bqhw", mask_embed, feat)
    A = jnp.asarray(build_interp_matrix(H, FH))
    Bm = jnp.asarray(build_interp_matrix(W, FW))
    up = jnp.einsum("Hh,bqhw,Ww->bqHW", A, pred_masks, Bm)
    p = jax.nn.softmax(logits, axis=-1)[:, :NUM_CLASSES]
    s = jax.nn.sigmoid(up)
    return jnp.einsum("qc,bqHW->bcHW", p, s)


# ----------------------------------- main -----------------------------------
def make_params(key):
    ks = jax.random.split(key, 8)
    return {
        "backbone_w": 0.1 * jax.random.normal(ks[0], (C_IN, D), jnp.float32),
        "backbone_b": 0.1 * jax.random.normal(ks[1], (D,), jnp.float32),
        "query_embed": 0.1 * jax.random.normal(ks[2], (Q, D), jnp.float32),
        "class_w": 0.1 * jax.random.normal(ks[3], (D, K1), jnp.float32),
        "class_b": 0.1 * jax.random.normal(ks[4], (K1,), jnp.float32),
        "mask_w": 0.1 * jax.random.normal(ks[5], (D, D), jnp.float32),
        "mask_b": 0.1 * jax.random.normal(ks[6], (D,), jnp.float32),
    }


if __name__ == "__main__":
    key = jax.random.PRNGKey(0)
    k_img, k_par = jax.random.split(key)
    images = jax.random.uniform(
        k_img, (B, C_IN, H, W), jnp.float32, minval=0.0, maxval=255.0
    )
    params = make_params(k_par)
    pool_mat = build_pool_matrix()
    up_mat = build_upsample_matrix()

    results = maskformer_forward(images, params, pool_mat, up_mat)
    sem = jnp.stack([r["sem_seg"] for r in results], axis=0)
    sem = jax.block_until_ready(sem)
    assert sem.shape == (B, NUM_CLASSES, H, W), sem.shape

    ref = jax.block_until_ready(reference_forward(images, params))
    np.testing.assert_allclose(np.asarray(sem), np.asarray(ref), rtol=1e-2, atol=1e-2)

    print("KERNEL_OK")
</pallas_src>

<mosaic_0001>
module attributes {stable_mosaic.version = 11 : i64} {
  func.func @_maskformer_kernel(%arg0: i32, %arg1: memref<1x3x1024xf32, #tpu.memory_space<vmem>>, %arg2: memref<1024x64xf32, #tpu.memory_space<vmem>>, %arg3: memref<64x1024xf32, #tpu.memory_space<vmem>>, %arg4: memref<32x3xf32, #tpu.memory_space<vmem>>, %arg5: memref<32x1xf32, #tpu.memory_space<vmem>>, %arg6: memref<8x32xf32, #tpu.memory_space<vmem>>, %arg7: memref<32x17xf32, #tpu.memory_space<vmem>>, %arg8: memref<1x17xf32, #tpu.memory_space<vmem>>, %arg9: memref<32x32xf32, #tpu.memory_space<vmem>>, %arg10: memref<1x32xf32, #tpu.memory_space<vmem>>, %arg11: memref<1x16x1024xf32, #tpu.memory_space<vmem>>) attributes {dimension_semantics = [#tpu.dimension_semantics<parallel>], iteration_bounds = array<i64: 2>, scalar_prefetch = 0 : i64, scratch_operands = 0 : i64, tpu.core_type = #tpu.core_type<tc>, window_params = [{transform_indices = @transform_0, window_bounds = array<i64: 1, 3, 1024>}, {pipeline_mode = #tpu.pipeline_mode<synchronous>, transform_indices = @transform_1, window_bounds = array<i64: 1024, 64>}, {pipeline_mode = #tpu.pipeline_mode<synchronous>, transform_indices = @transform_2, window_bounds = array<i64: 64, 1024>}, {pipeline_mode = #tpu.pipeline_mode<synchronous>, transform_indices = @transform_3, window_bounds = array<i64: 32, 3>}, {pipeline_mode = #tpu.pipeline_mode<synchronous>, transform_indices = @transform_4, window_bounds = array<i64: 32, 1>}, {pipeline_mode = #tpu.pipeline_mode<synchronous>, transform_indices = @transform_5, window_bounds = array<i64: 8, 32>}, {pipeline_mode = #tpu.pipeline_mode<synchronous>, transform_indices = @transform_6, window_bounds = array<i64: 32, 17>}, {pipeline_mode = #tpu.pipeline_mode<synchronous>, transform_indices = @transform_7, window_bounds = array<i64: 1, 17>}, {pipeline_mode = #tpu.pipeline_mode<synchronous>, transform_indices = @transform_8, window_bounds = array<i64: 32, 32>}, {pipeline_mode = #tpu.pipeline_mode<synchronous>, transform_indices = @transform_9, window_bounds = array<i64: 1, 32>}, {transform_indices = @transform_10, window_bounds = array<i64: 1, 16, 1024>}]} {
    %c0 = arith.constant 0 : index
    %c0_0 = arith.constant 0 : index
    %c0_1 = arith.constant 0 : index
    %0 = vector.load %arg1[%c0, %c0_0, %c0_1] : memref<1x3x1024xf32, #tpu.memory_space<vmem>>, vector<1x3x1024xf32>
    %1 = vector.shape_cast %0 : vector<1x3x1024xf32> to vector<3x1024xf32>
    %c0_2 = arith.constant 0 : index
    %c0_3 = arith.constant 0 : index
    %2 = vector.load %arg2[%c0_2, %c0_3] : memref<1024x64xf32, #tpu.memory_space<vmem>>, vector<1024x64xf32>
    %cst = arith.constant dense<0.000000e+00> : vector<3x64xf32>
    %3 = tpu.matmul %1, %2, %cst {dimension_numbers = #tpu.dot_dimension_numbers<[1], [0], [0], [1], [0, 0, 1, 1], [], []>} : vector<3x1024xf32>, vector<1024x64xf32>, vector<3x64xf32> -> vector<3x64xf32>
    %c0_4 = arith.constant 0 : index
    %c0_5 = arith.constant 0 : index
    %4 = vector.load %arg5[%c0_4, %c0_5] : memref<32x1xf32, #tpu.memory_space<vmem>>, vector<32x1xf32>
    %c0_6 = arith.constant 0 : index
    %c0_7 = arith.constant 0 : index
    %5 = vector.load %arg4[%c0_6, %c0_7] : memref<32x3xf32, #tpu.memory_space<vmem>>, vector<32x3xf32>
    %6 = vector.extract_strided_slice %5 {offsets = [0, 0], sizes = [32, 1], strides = [1, 1]} : vector<32x3xf32> to vector<32x1xf32>
    %7 = vector.extract_strided_slice %3 {offsets = [0, 0], sizes = [1, 64], strides = [1, 1]} : vector<3x64xf32> to vector<1x64xf32>
    %8 = vector.broadcast %6 : vector<32x1xf32> to vector<32x64xf32>
    %9 = vector.broadcast %7 : vector<1x64xf32> to vector<32x64xf32>
    %10 = arith.mulf %8, %9 : vector<32x64xf32>
    %11 = vector.broadcast %4 : vector<32x1xf32> to vector<32x64xf32>
    %12 = arith.addf %11, %10 : vector<32x64xf32>
    %13 = vector.extract_strided_slice %5 {offsets = [0, 1], sizes = [32, 1], strides = [1, 1]} : vector<32x3xf32> to vector<32x1xf32>
    %14 = vector.extract_strided_slice %3 {offsets = [1, 0], sizes = [1, 64], strides = [1, 1]} : vector<3x64xf32> to vector<1x64xf32>
    %15 = vector.broadcast %13 : vector<32x1xf32> to vector<32x64xf32>
    %16 = vector.broadcast %14 : vector<1x64xf32> to vector<32x64xf32>
    %17 = arith.mulf %15, %16 : vector<32x64xf32>
    %18 = arith.addf %12, %17 : vector<32x64xf32>
    %19 = vector.extract_strided_slice %5 {offsets = [0, 2], sizes = [32, 1], strides = [1, 1]} : vector<32x3xf32> to vector<32x1xf32>
    %20 = vector.extract_strided_slice %3 {offsets = [2, 0], sizes = [1, 64], strides = [1, 1]} : vector<3x64xf32> to vector<1x64xf32>
    %21 = vector.broadcast %19 : vector<32x1xf32> to vector<32x64xf32>
    %22 = vector.broadcast %20 : vector<1x64xf32> to vector<32x64xf32>
    %23 = arith.mulf %21, %22 : vector<32x64xf32>
    %24 = arith.addf %18, %23 : vector<32x64xf32>
    %c0_8 = arith.constant 0 : index
    %c0_9 = arith.constant 0 : index
    %25 = vector.load %arg6[%c0_8, %c0_9] : memref<8x32xf32, #tpu.memory_space<vmem>>, vector<8x32xf32>
    %c0_10 = arith.constant 0 : index
    %c0_11 = arith.constant 0 : index
    %26 = vector.load %arg7[%c0_10, %c0_11] : memref<32x17xf32, #tpu.memory_space<vmem>>, vector<32x17xf32>
    %cst_12 = arith.constant dense<0.000000e+00> : vector<8x17xf32>
    %27 = tpu.matmul %25, %26, %cst_12 {dimension_numbers = #tpu.dot_dimension_numbers<[1], [0], [0], [1], [0, 0, 1, 1], [], []>} : vector<8x32xf32>, vector<32x17xf32>, vector<8x17xf32> -> vector<8x17xf32>
    %c0_13 = arith.constant 0 : index
    %c0_14 = arith.constant 0 : index
    %28 = vector.load %arg8[%c0_13, %c0_14] : memref<1x17xf32, #tpu.memory_space<vmem>>, vector<1x17xf32>
    %29 = vector.broadcast %28 : vector<1x17xf32> to vector<8x17xf32>
    %30 = arith.addf %27, %29 : vector<8x17xf32>
    %cst_15 = arith.constant dense<0xFF800000> : vector<8xf32>
    %31 = vector.multi_reduction <maximumf>, %30, %cst_15 [1] : vector<8x17xf32> to vector<8xf32>
    %32 = vector.shape_cast %31 : vector<8xf32> to vector<8x1xf32>
    %33 = vector.broadcast %32 : vector<8x1xf32> to vector<8x17xf32>
    %34 = arith.subf %30, %33 : vector<8x17xf32>
    %35 = math.exp %34 : vector<8x17xf32>
    %36 = vector.extract_strided_slice %35 {offsets = [0, 0], sizes = [8, 16], strides = [1, 1]} : vector<8x17xf32> to vector<8x16xf32>
    %cst_16 = arith.constant dense<0.000000e+00> : vector<8xf32>
    %37 = vector.multi_reduction <add>, %35, %cst_16 [1] : vector<8x17xf32> to vector<8xf32>
    %38 = vector.shape_cast %37 : vector<8xf32> to vector<8x1xf32>
    %39 = vector.broadcast %38 : vector<8x1xf32> to vector<8x16xf32>
    %40 = arith.divf %36, %39 : vector<8x16xf32>
    %c0_17 = arith.constant 0 : index
    %c0_18 = arith.constant 0 : index
    %41 = vector.load %arg9[%c0_17, %c0_18] : memref<32x32xf32, #tpu.memory_space<vmem>>, vector<32x32xf32>
    %cst_19 = arith.constant dense<0.000000e+00> : vector<8x32xf32>
    %42 = tpu.matmul %25, %41, %cst_19 {dimension_numbers = #tpu.dot_dimension_numbers<[1], [0], [0], [1], [0, 0, 1, 1], [], []>} : vector<8x32xf32>, vector<32x32xf32>, vector<8x32xf32> -> vector<8x32xf32>
    %c0_20 = arith.constant 0 : index
    %c0_21 = arith.constant 0 : index
    %43 = vector.load %arg10[%c0_20, %c0_21] : memref<1x32xf32, #tpu.memory_space<vmem>>, vector<1x32xf32>
    %44 = vector.broadcast %43 : vector<1x32xf32> to vector<8x32xf32>
    %45 = arith.addf %42, %44 : vector<8x32xf32>
    %cst_22 = arith.constant dense<0.000000e+00> : vector<8x64xf32>
    %46 = tpu.matmul %45, %24, %cst_22 {dimension_numbers = #tpu.dot_dimension_numbers<[1], [0], [0], [1], [0, 0, 1, 1], [], []>} : vector<8x32xf32>, vector<32x64xf32>, vector<8x64xf32> -> vector<8x64xf32>
    %c0_23 = arith.constant 0 : index
    %c0_24 = arith.constant 0 : index
    %47 = vector.load %arg3[%c0_23, %c0_24] : memref<64x1024xf32, #tpu.memory_space<vmem>>, vector<64x1024xf32>
    %cst_25 = arith.constant dense<0.000000e+00> : vector<8x1024xf32>
    %48 = tpu.matmul %46, %47, %cst_25 {dimension_numbers = #tpu.dot_dimension_numbers<[1], [0], [0], [1], [0, 0, 1, 1], [], []>} : vector<8x64xf32>, vector<64x1024xf32>, vector<8x1024xf32> -> vector<8x1024xf32>
    %49 = arith.negf %48 : vector<8x1024xf32>
    %50 = math.exp %49 : vector<8x1024xf32>
    %cst_26 = arith.constant 1.000000e+00 : f32
    %51 = vector.broadcast %cst_26 : f32 to vector<8x1024xf32>
    %52 = arith.addf %51, %50 : vector<8x1024xf32>
    %53 = arith.divf %51, %52 : vector<8x1024xf32>
    "tpu.trace_start"() <{level = 10 : i32, message = "qc,qs->cs"}> : () -> ()
    %cst_27 = arith.constant dense<0.000000e+00> : vector<16x1024xf32>
    %54 = tpu.matmul %40, %53, %cst_27 {dimension_numbers = #tpu.dot_dimension_numbers<[0], [0], [1], [1], [0, 1, 1, 1], [], []>} : vector<8x16xf32>, vector<8x1024xf32>, vector<16x1024xf32> -> vector<16x1024xf32>
    "tpu.trace_stop"() : () -> ()
    %c0_28 = arith.constant 0 : index
    %c0_29 = arith.constant 0 : index
    %c0_30 = arith.constant 0 : index
    %55 = vector.load %arg11[%c0_28, %c0_29, %c0_30] : memref<1x16x1024xf32, #tpu.memory_space<vmem>>, vector<1x16x1024xf32>
    %56 = vector.shape_cast %55 : vector<1x16x1024xf32> to vector<16x1024xf32>
    %57 = vector.shape_cast %54 : vector<16x1024xf32> to vector<1x16x1024xf32>
    tpu.vector_store %arg11[%c0_28, %c0_29, %c0_30], %57 {strides = array<i32>} : memref<1x16x1024xf32, #tpu.memory_space<vmem>>, vector<1x16x1024xf32>,
    return
  }
  func.func @transform_0(%arg0: i32) -> (i32, i32, i32) {
    %c0_i32 = arith.constant 0 : i32
    %c0_i32_0 = arith.constant 0 : i32
    %c0_i32_1 = arith.constant 0 : i32
    return %arg0, %c0_i32, %c0_i32_0 : i32, i32, i32
  }
  func.func @transform_1(%arg0: i32) -> (i32, i32) {
    %c0_i32 = arith.constant 0 : i32
    %c0_i32_0 = arith.constant 0 : i32
    %c0_i32_1 = arith.constant 0 : i32
    return %c0_i32, %c0_i32_0 : i32, i32
  }
  func.func @transform_2(%arg0: i32) -> (i32, i32) {
    %c0_i32 = arith.constant 0 : i32
    %c0_i32_0 = arith.constant 0 : i32
    %c0_i32_1 = arith.constant 0 : i32
    return %c0_i32, %c0_i32_0 : i32, i32
  }
  func.func @transform_3(%arg0: i32) -> (i32, i32) {
    %c0_i32 = arith.constant 0 : i32
    %c0_i32_0 = arith.constant 0 : i32
    %c0_i32_1 = arith.constant 0 : i32
    return %c0_i32, %c0_i32_0 : i32, i32
  }
  func.func @transform_4(%arg0: i32) -> (i32, i32) {
    %c0_i32 = arith.constant 0 : i32
    %c0_i32_0 = arith.constant 0 : i32
    %c0_i32_1 = arith.constant 0 : i32
    return %c0_i32, %c0_i32_0 : i32, i32
  }
  func.func @transform_5(%arg0: i32) -> (i32, i32) {
    %c0_i32 = arith.constant 0 : i32
    %c0_i32_0 = arith.constant 0 : i32
    %c0_i32_1 = arith.constant 0 : i32
    return %c0_i32, %c0_i32_0 : i32, i32
  }
  func.func @transform_6(%arg0: i32) -> (i32, i32) {
    %c0_i32 = arith.constant 0 : i32
    %c0_i32_0 = arith.constant 0 : i32
    %c0_i32_1 = arith.constant 0 : i32
    return %c0_i32, %c0_i32_0 : i32, i32
  }
  func.func @transform_7(%arg0: i32) -> (i32, i32) {
    %c0_i32 = arith.constant 0 : i32
    %c0_i32_0 = arith.constant 0 : i32
    %c0_i32_1 = arith.constant 0 : i32
    return %c0_i32, %c0_i32_0 : i32, i32
  }
  func.func @transform_8(%arg0: i32) -> (i32, i32) {
    %c0_i32 = arith.constant 0 : i32
    %c0_i32_0 = arith.constant 0 : i32
    %c0_i32_1 = arith.constant 0 : i32
    return %c0_i32, %c0_i32_0 : i32, i32
  }
  func.func @transform_9(%arg0: i32) -> (i32, i32) {
    %c0_i32 = arith.constant 0 : i32
    %c0_i32_0 = arith.constant 0 : i32
    %c0_i32_1 = arith.constant 0 : i32
    return %c0_i32, %c0_i32_0 : i32, i32
  }
  func.func @transform_10(%arg0: i32) -> (i32, i32, i32) {
    %c0_i32 = arith.constant 0 : i32
    %c0_i32_0 = arith.constant 0 : i32
    %c0_i32_1 = arith.constant 0 : i32
    return %arg0, %c0_i32, %c0_i32_0 : i32, i32, i32
  }
}

</mosaic_0001>

<bundles_post_ra>
// kernel: _maskformer_fused.1
= control target key start
LH: loop header
LB: loop body
LE: loop exit
PB: predicated region body
PF: predicated region fallthrough
CT: control target
= control target key end

     0   :  { %s2541_s13 = smov 0   ;;  %s3310_s0 = inlined_call_operand.vmem [shape: f32[2,3,1024], index: 0, kind: input, shape index: {}]   ;;  %s3311_s1 = inlined_call_operand.vmem [shape: f32[1024,64], index: 1, kind: input, shape index: {}]   ;;  %s3312_s2 = inlined_call_operand.vmem [shape: f32[64,1024], index: 2, kind: input, shape index: {}]   ;;  %s3313_s3 = inlined_call_operand.vmem [shape: f32[32,3], index: 3, kind: input, shape index: {}]   ;;  %s3314_s4 = inlined_call_operand.vmem [shape: f32[32,1], index: 4, kind: input, shape index: {}]   ;;  %s3315_s5 = inlined_call_operand.vmem [shape: f32[8,32], index: 5, kind: input, shape index: {}]   ;;  %s3316_s6 = inlined_call_operand.vmem [shape: f32[32,17], index: 6, kind: input, shape index: {}]   ;;  %s3317_s7 = inlined_call_operand.vmem [shape: f32[1,17], index: 7, kind: input, shape index: {}]   ;;  %s3318_s8 = inlined_call_operand.vmem [shape: f32[32,32], index: 8, kind: input, shape index: {}]   ;;  %s3319_s9 = inlined_call_operand.vmem [shape: f32[1,32], index: 9, kind: input, shape index: {}]   ;;  %s3320_s10 = inlined_call_operand.vmem [shape: f32[2,16,1024], index: 10, kind: output, shape index: {}]  }
   0x1 LB: > { %s1970_s14 = sadd.s32 4294967295, %s2478_s13   ;;  %p1974_p0 = scmp.ge.s32.totalorder %s2478_s13, 1  ;;  %s2478_s13 = sphi %s2541_s13, %s20_s13  }
   0x2   : > { %p312_p1 = scmp.lt.s32.totalorder %s2478_s13, 3 }
   0x4   : > { %p313_p2 = pnand %p1974_p0, %p312_p1 }
   0x5   : > { %v380_v0 = vld [vmem:[%s3311_s1 + $0x80] sm:$0xff] (!%p313_p2)  ;;  %v381_v1 = vld [vmem:[%s3311_s1 + $0x88] sm:$0xff] (!%p313_p2)  ;;  %v382_v11 = vld [vmem:[%s3311_s1 + $0x90] sm:$0xff] (!%p313_p2)  ;;  %v2480_v12 = vmov (!%p313_p2), 0   ;;  %p2625_p3 = scmp.lt.s32.totalorder (!%p313_p2), %s1970_s14, 1  ;;  %vm2484_vm0 = vmmov (!%p313_p2), 0  }
   0x6   : > { %316 = sbr.rel (%p313_p2) target bundleno = 1001 (0x3e9), region = 60  ;;  %v412_v2 = vld [vmem:[%s3311_s1 + $0x180] sm:$0xff] (!%p313_p2)  ;;  %v2196_v3 = vpack.c.bf16 (!%p313_p2), %v381_v1, %v380_v0  ;;  %v413_v4 = vld [vmem:[%s3311_s1 + $0x188] sm:$0xff] (!%p313_p2)  ;;  %2423 = vset.pattern.permute.xlu1 (!%p313_p2), %v2480_v12  ;;  %2422 = vset.pattern.permute.xlu0 (!%p313_p2), %v2480_v12  ;;  %v383_v14 = vld [vmem:[%s3311_s1 + $0x98] sm:$0xff] (!%p313_p2)  ;;  %vm912_vm1 = vcmask (!%p313_p2), 261120   ;;  %vm986_vm2 = vcmask (!%p313_p2), 138240  }
   0x7   : > { %v364_v5 = vld [vmem:[%s3311_s1] sm:$0xff] (!%p313_p2)  ;;  %v365_v6 = vld [vmem:[%s3311_s1 + $0x8] sm:$0xff] (!%p313_p2)  ;;  %v2228_v7 = vpack.c.bf16 (!%p313_p2), %v413_v4, %v412_v2  ;;  %v414_v15 = vld [vmem:[%s3311_s1 + $0x190] sm:$0xff] (!%p313_p2)  ;;  %v2200_v17 = vpack.c.bf16 (!%p313_p2), %v383_v14, %v382_v11  ;;  %vm1216_vm3 = vcmask (!%p313_p2), 523264   ;;  %vm1584_vm4 = vcmask (!%p313_p2), 64512  }
   0x8   : > { %v2198_v8 = vpack.c.bf16 (!%p313_p2), %v365_v6, %v364_v5  ;;  %v396_v9 = vld [vmem:[%s3311_s1 + $0x100] sm:$0xff] (!%p313_p2)  ;;  %v397_v10 = vld [vmem:[%s3311_s1 + $0x108] sm:$0xff] (!%p313_p2)  ;;  %2197 = vmatprep.subr.bf16.mxu0 (!%p313_p2), %v2196_v3  ;;  %v415_v16 = vld [vmem:[%s3311_s1 + $0x198] sm:$0xff] (!%p313_p2) }
   0x9   : > { %v2230_v13 = vpack.c.bf16 (!%p313_p2), %v397_v10, %v396_v9  ;;  %2229 = vmatprep.subr.bf16.mxu1 (!%p313_p2), %v2228_v7  ;;  %v2232_v18 = vpack.c.bf16 (!%p313_p2), %v415_v16, %v414_v15  ;;  %v366_v19 = vld [vmem:[%s3311_s1 + $0x10] sm:$0xff] (!%p313_p2)  ;;  %v367_v20 = vld [vmem:[%s3311_s1 + $0x18] sm:$0xff] (!%p313_p2)  ;;  %v384_v24 = vld [vmem:[%s3311_s1 + $0xa0] sm:$0xff] (!%p313_p2) }
   0xa   : > { %2199 = vmatpush3.bf16.msra.mxu0 (!%p313_p2), %v2198_v8  ;;  %v398_v21 = vld [vmem:[%s3311_s1 + $0x110] sm:$0xff] (!%p313_p2)  ;;  %v2202_v22 = vpack.c.bf16 (!%p313_p2), %v367_v20, %v366_v19  ;;  %v399_v23 = vld [vmem:[%s3311_s1 + $0x118] sm:$0xff] (!%p313_p2)  ;;  %v385_v25 = vld [vmem:[%s3311_s1 + $0xa8] sm:$0xff] (!%p313_p2) }
   0xb   : > { %2231 = vmatpush3.bf16.msra.mxu1 (!%p313_p2), %v2230_v13  ;;  %2201 = vmatprep.subr.bf16.mxu0 (!%p313_p2), %v2200_v17  ;;  %v2234_v26 = vpack.c.bf16 (!%p313_p2), %v399_v23, %v398_v21  ;;  %v2204_v27 = vpack.c.bf16 (!%p313_p2), %v385_v25, %v384_v24  ;;  %v416_v28 = vld [vmem:[%s3311_s1 + $0x1a0] sm:$0xff] (!%p313_p2)  ;;  %v417_v29 = vld [vmem:[%s3311_s1 + $0x1a8] sm:$0xff] (!%p313_p2)  ;;  %v386_v36 = vld [vmem:[%s3311_s1 + $0xb0] sm:$0xff] (!%p313_p2) }
   0xc   : > { %2233 = vmatprep.subr.bf16.mxu1 (!%p313_p2), %v2232_v18  ;;  %v368_v30 = vld [vmem:[%s3311_s1 + $0x20] sm:$0xff] (!%p313_p2)  ;;  %v2236_v31 = vpack.c.bf16 (!%p313_p2), %v417_v29, %v416_v28  ;;  %v369_v32 = vld [vmem:[%s3311_s1 + $0x28] sm:$0xff] (!%p313_p2)  ;;  %v387_v37 = vld [vmem:[%s3311_s1 + $0xb8] sm:$0xff] (!%p313_p2) }
   0xd   : > { %v400_v33 = vld [vmem:[%s3311_s1 + $0x120] sm:$0xff]  ;;  %v401_v34 = vld [vmem:[%s3311_s1 + $0x128] sm:$0xff]  ;;  %v2206_v35 = vpack.c.bf16 %v369_v32, %v368_v30  ;;  %v418_v38 = vld [vmem:[%s3311_s1 + $0x1b0] sm:$0xff]  ;;  %v2208_v40 = vpack.c.bf16 %v387_v37, %v386_v36  ;;  %s3323_s14 = smov (!%p2625_p3, %s1970_s14), 1 }
   0xe   : > { %2203 = vmatpush3.bf16.msra.mxu0 %v2202_v22  ;;  %v2238_v39 = vpack.c.bf16 %v401_v34, %v400_v33  ;;  %v419_v41 = vld [vmem:[%s3311_s1 + $0x1b8] sm:$0xff]  ;;  %v370_v42 = vld [vmem:[%s3311_s1 + $0x30] sm:$0xff]  ;;  %v388_v47 = vld [vmem:[%s3311_s1 + $0xc0] sm:$0xff]  ;;  %s2006_s15 = sshll.u32 %s3323_s14, 5  ;;  %s2007_s17 = sshll.u32 %s3323_s14, 7 }
   0xf   : > { %2235 = vmatpush3.bf16.msra.mxu1 %v2234_v26  ;;  %2205 = vmatprep.subr.bf16.mxu0 %v2204_v27  ;;  %v371_v43 = vld [vmem:[%s3311_s1 + $0x38] sm:$0xff]  ;;  %v2240_v44 = vpack.c.bf16 %v419_v41, %v418_v38  ;;  %v402_v45 = vld [vmem:[%s3311_s1 + $0x130] sm:$0xff]  ;;  %v389_v48 = vld [vmem:[%s3311_s1 + $0xc8] sm:$0xff]  ;;  %s2717_s30 = scalar_lea.vmem %s3310_s0, %s2006_s15  ;;  %s3289_s20 = scalar_lea.vmem %s3320_s10, %s2007_s17 }
  0x10   : > { %2237 = vmatprep.subr.bf16.mxu1 %v2236_v31  ;;  %v403_v46 = vld [vmem:[%s3311_s1 + $0x138] sm:$0xff]  ;;  %v420_v49 = vld [vmem:[%s3311_s1 + $0x1c0] sm:$0xff]  ;;  %v421_v50 = vld [vmem:[%s3311_s1 + $0x1c8] sm:$0xff]  ;;  %v2210_v51 = vpack.c.bf16 %v371_v43, %v370_v42  ;;  %v2212_v53 = vpack.c.bf16 %v389_v48, %v388_v47 }
  0x11   : > { %v2242_v52 = vpack.c.bf16 %v403_v46, %v402_v45  ;;  %v372_v54 = vld [vmem:[%s3311_s1 + $0x40] sm:$0xff]  ;;  %v373_v55 = vld [vmem:[%s3311_s1 + $0x48] sm:$0xff]  ;;  %v2244_v57 = vpack.c.bf16 %v421_v50, %v420_v49  ;;  %v390_v59 = vld [vmem:[%s3311_s1 + $0xd0] sm:$0xff] }
  0x12   : > { %2207 = vmatpush3.bf16.msra.mxu0 %v2206_v35  ;;  %v404_v56 = vld [vmem:[%s3311_s1 + $0x140] sm:$0xff]  ;;  %v405_v58 = vld [vmem:[%s3311_s1 + $0x148] sm:$0xff]  ;;  %v391_v60 = vld [vmem:[%s3311_s1 + $0xd8] sm:$0xff]  ;;  %v2214_v63 = vpack.c.bf16 %v373_v55, %v372_v54 }
  0x13   : > { %2239 = vmatpush3.bf16.msra.mxu1 %v2238_v39  ;;  %2209 = vmatprep.subr.bf16.mxu0 %v2208_v40  ;;  %v422_v61 = vld [vmem:[%s3311_s1 + $0x1d0] sm:$0xff]  ;;  %v423_v62 = vld [vmem:[%s3311_s1 + $0x1d8] sm:$0xff]  ;;  %v2246_v0 = vpack.c.bf16 %v405_v58, %v404_v56  ;;  %v2216_v1 = vpack.c.bf16 %v391_v60, %v390_v59  ;;  %v392_v7 = vld [vmem:[%s3311_s1 + $0xe0] sm:$0xff] }
  0x14   : > { %2241 = vmatprep.subr.bf16.mxu1 %v2240_v44  ;;  %v374_v2 = vld [vmem:[%s3311_s1 + $0x50] sm:$0xff]  ;;  %v375_v3 = vld [vmem:[%s3311_s1 + $0x58] sm:$0xff]  ;;  %v2248_v5 = vpack.c.bf16 %v423_v62, %v422_v61  ;;  %v393_v8 = vld [vmem:[%s3311_s1 + $0xe8] sm:$0xff] }
  0x15   : > { %v406_v4 = vld [vmem:[%s3311_s1 + $0x150] sm:$0xff]  ;;  %v407_v6 = vld [vmem:[%s3311_s1 + $0x158] sm:$0xff]  ;;  %v424_v9 = vld [vmem:[%s3311_s1 + $0x1e0] sm:$0xff]  ;;  %v2218_v11 = vpack.c.bf16 %v375_v3, %v374_v2  ;;  %v2220_v16 = vpack.c.bf16 %v393_v8, %v392_v7 }
  0x16   : > { %2211 = vmatpush3.bf16.msra.mxu0 %v2210_v51  ;;  %v425_v10 = vld [vmem:[%s3311_s1 + $0x1e8] sm:$0xff]  ;;  %v376_v13 = vld [vmem:[%s3311_s1 + $0x60] sm:$0xff]  ;;  %v2250_v15 = vpack.c.bf16 %v407_v6, %v406_v4  ;;  %v394_v22 = vld [vmem:[%s3311_s1 + $0xf0] sm:$0xff] }
  0x17   : > { %2243 = vmatpush3.bf16.msra.mxu1 %v2242_v52  ;;  %2213 = vmatprep.subr.bf16.mxu0 %v2212_v53  ;;  %v377_v14 = vld [vmem:[%s3311_s1 + $0x68] sm:$0xff]  ;;  %v408_v17 = vld [vmem:[%s3311_s1 + $0x160] sm:$0xff]  ;;  %v2252_v20 = vpack.c.bf16 %v425_v10, %v424_v9  ;;  %v395_v23 = vld [vmem:[%s3311_s1 + $0xf8] sm:$0xff] }
  0x18   : > { %2245 = vmatprep.subr.bf16.mxu1 %v2244_v57  ;;  %v360_v18 = vld [vmem:[%s2717_s30] sm:$0x77]  ;;  %v361_v19 = vld [vmem:[%s2717_s30 + $0x8] sm:$0x77]  ;;  %v426_v26 = vld [vmem:[%s3311_s1 + $0x1f0] sm:$0xff]  ;;  %v2222_v28 = vpack.c.bf16 %v377_v14, %v376_v13  ;;  %v2224_v30 = vpack.c.bf16 %v395_v23, %v394_v22 }
  0x19   : > { %v409_v21 = vld [vmem:[%s3311_s1 + $0x168] sm:$0xff]  ;;  %v496_v24 = vcombine.high %v360_v18, %v360_v18  ;;  %v497_v25 = vcombine.high %v361_v19, %v361_v19  ;;  %v427_v27 = vld [vmem:[%s3311_s1 + $0x1f8] sm:$0xff]  ;;  %v378_v31 = vld [vmem:[%s3311_s1 + $0x70] sm:$0xff] }
  0x1a   : > { %2215 = vmatpush3.bf16.msra.mxu0 %v2214_v63  ;;  %v2254_v29 = vpack.c.bf16 %v409_v21, %v408_v17  ;;  %v379_v32 = vld [vmem:[%s3311_s1 + $0x78] sm:$0xff]  ;;  %v410_v33 = vld [vmem:[%s3311_s1 + $0x170] sm:$0xff]  ;;  %v2256_v34 = vpack.c.bf16 %v427_v27, %v426_v26  ;;  %v444_v36 = vld [vmem:[%s3311_s1 + $0x280] sm:$0xff] }
  0x1b   : > { %2247 = vmatpush3.bf16.msra.mxu1 %v2246_v0  ;;  %2217 = vmatprep.subr.bf16.mxu0 %v2216_v1  ;;  %v411_v35 = vld [vmem:[%s3311_s1 + $0x178] sm:$0xff]  ;;  %v445_v37 = vld [vmem:[%s3311_s1 + $0x288] sm:$0xff]  ;;  %v476_v38 = vld [vmem:[%s3311_s1 + $0x380] sm:$0xff]  ;;  %v2226_v40 = vpack.c.bf16 %v379_v32, %v378_v31 }
  0x1c   : > { %2249 = vmatprep.subr.bf16.mxu1 %v2248_v5  ;;  %568 = vmatprep.mubr.f32.mxu0 %v496_v24  ;;  %v477_v39 = vld [vmem:[%s3311_s1 + $0x388] sm:$0xff]  ;;  %v2258_v41 = vpack.c.bf16 %v411_v35, %v410_v33  ;;  %v2260_v42 = vpack.c.bf16 %v445_v37, %v444_v36  ;;  %v428_v43 = vld [vmem:[%s3311_s1 + $0x200] sm:$0xff]  ;;  %v446_v48 = vld [vmem:[%s3311_s1 + $0x290] sm:$0xff] }
  0x1d   : > { %638 = vmatprep.mubr.f32.mxu1 %v497_v25  ;;  %v429_v44 = vld [vmem:[%s3311_s1 + $0x208] sm:$0xff]  ;;  %v460_v45 = vld [vmem:[%s3311_s1 + $0x300] sm:$0xff]  ;;  %v2292_v46 = vpack.c.bf16 %v477_v39, %v476_v38  ;;  %v447_v49 = vld [vmem:[%s3311_s1 + $0x298] sm:$0xff] }
  0x1e   : > { %2219 = vmatpush3.bf16.msra.mxu0 %v2218_v11  ;;  %v461_v47 = vld [vmem:[%s3311_s1 + $0x308] sm:$0xff]  ;;  %v478_v50 = vld [vmem:[%s3311_s1 + $0x390] sm:$0xff]  ;;  %v479_v51 = vld [vmem:[%s3311_s1 + $0x398] sm:$0xff]  ;;  %v2262_v52 = vpack.c.bf16 %v429_v44, %v428_v43  ;;  %v2264_v54 = vpack.c.bf16 %v447_v49, %v446_v48 }
  0x1f   : > { %2251 = vmatpush3.bf16.msra.mxu1 %v2250_v15  ;;  %2221 = vmatprep.subr.bf16.mxu0 %v2220_v16  ;;  %v2294_v53 = vpack.c.bf16 %v461_v47, %v460_v45  ;;  %v430_v55 = vld [vmem:[%s3311_s1 + $0x210] sm:$0xff]  ;;  %v431_v56 = vld [vmem:[%s3311_s1 + $0x218] sm:$0xff]  ;;  %v2296_v58 = vpack.c.bf16 %v479_v51, %v478_v50  ;;  %v448_v60 = vld [vmem:[%s3311_s1 + $0x2a0] sm:$0xff] }
  0x20   : > { %2253 = vmatprep.subr.bf16.mxu1 %v2252_v20  ;;  %v462_v57 = vld [vmem:[%s3311_s1 + $0x310] sm:$0xff]  ;;  %v463_v59 = vld [vmem:[%s3311_s1 + $0x318] sm:$0xff]  ;;  %v449_v61 = vld [vmem:[%s3311_s1 + $0x2a8] sm:$0xff]  ;;  %v2266_v0 = vpack.c.bf16 %v431_v56, %v430_v55 }
  0x21   : > { %v480_v62 = vld [vmem:[%s3311_s1 + $0x3a0] sm:$0xff]  ;;  %v481_v63 = vld [vmem:[%s3311_s1 + $0x3a8] sm:$0xff]  ;;  %v2298_v1 = vpack.c.bf16 %v463_v59, %v462_v57  ;;  %v2268_v2 = vpack.c.bf16 %v449_v61, %v448_v60  ;;  %v450_v8 = vld [vmem:[%s3311_s1 + $0x2b0] sm:$0xff] }
  0x22   : > { %2223 = vmatpush3.bf16.msra.mxu0 %v2222_v28  ;;  %v432_v3 = vld [vmem:[%s3311_s1 + $0x220] sm:$0xff]  ;;  %v433_v4 = vld [vmem:[%s3311_s1 + $0x228] sm:$0xff]  ;;  %v2300_v6 = vpack.c.bf16 %v481_v63, %v480_v62  ;;  %v451_v9 = vld [vmem:[%s3311_s1 + $0x2b8] sm:$0xff] }
  0x23   : > { %2255 = vmatpush3.bf16.msra.mxu1 %v2254_v29  ;;  %2225 = vmatprep.subr.bf16.mxu0 %v2224_v30  ;;  %v464_v5 = vld [vmem:[%s3311_s1 + $0x320] sm:$0xff]  ;;  %v465_v7 = vld [vmem:[%s3311_s1 + $0x328] sm:$0xff]  ;;  %v482_v10 = vld [vmem:[%s3311_s1 + $0x3b0] sm:$0xff]  ;;  %v2270_v13 = vpack.c.bf16 %v433_v4, %v432_v3  ;;  %v2272_v16 = vpack.c.bf16 %v451_v9, %v450_v8 }
  0x24   : > { %2257 = vmatprep.subr.bf16.mxu1 %v2256_v34  ;;  %v483_v11 = vld [vmem:[%s3311_s1 + $0x3b8] sm:$0xff]  ;;  %v434_v14 = vld [vmem:[%s3311_s1 + $0x230] sm:$0xff]  ;;  %v2302_v15 = vpack.c.bf16 %v465_v7, %v464_v5  ;;  %v452_v21 = vld [vmem:[%s3311_s1 + $0x2c0] sm:$0xff] }
  0x25   : > { %v435_v17 = vld [vmem:[%s3311_s1 + $0x238] sm:$0xff]  ;;  %v2304_v20 = vpack.c.bf16 %v483_v11, %v482_v10  ;;  %v453_v22 = vld [vmem:[%s3311_s1 + $0x2c8] sm:$0xff]  ;;  %v484_v23 = vld [vmem:[%s3311_s1 + $0x3c0] sm:$0xff] }
  0x26   : > { %2227 = vmatpush3.bf16.msra.mxu0 %v2226_v40  ;;  %v485_v24 = vld [vmem:[%s3311_s1 + $0x3c8] sm:$0xff]  ;;  %v2872_v25 = vld [vmem:[%s2717_s30 + $0x10] sm:$0x77]  ;;  %v2875_v26 = vld [vmem:[%s2717_s30 + $0x18] sm:$0x77]  ;;  %v2274_v27 = vpack.c.bf16 %v435_v17, %v434_v14  ;;  %v2276_v32 = vpack.c.bf16 %v453_v22, %v452_v21 }
  0x27   : > { %2259 = vmatpush3.bf16.msra.mxu1 %v2258_v41  ;;  %2261 = vmatprep.subr.bf16.mxu0 %v2260_v42  ;;  %v436_v28 = vld [vmem:[%s3311_s1 + $0x240] sm:$0xff]  ;;  %v498_v29 = vcombine.high %v2872_v25, %v2872_v25  ;;  %v499_v30 = vcombine.high %v2875_v26, %v2875_v26  ;;  %v437_v33 = vld [vmem:[%s3311_s1 + $0x248] sm:$0xff]  ;;  %v2308_v36 = vpack.c.bf16 %v485_v24, %v484_v23  ;;  %v454_v37 = vld [vmem:[%s3311_s1 + $0x2d0] sm:$0xff] }
  0x28   : > { %2293 = vmatprep.subr.bf16.mxu1 %v2292_v46  ;;  %v468_v34 = vld [vmem:[%s3311_s1 + $0x340] sm:$0xff]  ;;  %v469_v35 = vld [vmem:[%s3311_s1 + $0x348] sm:$0xff]  ;;  %v455_v38 = vld [vmem:[%s3311_s1 + $0x2d8] sm:$0xff]  ;;  %v2278_v43 = vpack.c.bf16 %v437_v33, %v436_v28  ;;  %v2483_v33 = vmov 2  }
  0x29   : > { %569 = vmatmul.mubr.f32.vlgmr.msra.gmra.mrb[0].mxu0 %v360_v18  ;;  %v466_v18 = vld [vmem:[%s3311_s1 + $0x330] sm:$0xff]  ;;  %v487_v40 = vld [vmem:[%s3311_s1 + $0x3d8] sm:$0xff]  ;;  %v784_v41 = vld [vmem:[%s3314_s4] sm:$0xff]  ;;  %v2310_v45 = vpack.c.bf16 %v469_v35, %v468_v34  ;;  %v2280_v46 = vpack.c.bf16 %v455_v38, %v454_v37  ;;  %v2485_v35 = vmov 0.0  }
  0x2a   : > { %639 = vmatmul.mubr.f32.vlgmr.msra.gmra.mrb[0].mxu1 %v361_v19  ;;  %2263 = vmatpush3.bf16.msra.mxu0 %v2262_v52  ;;  %v467_v19 = vld [vmem:[%s3311_s1 + $0x338] sm:$0xff]  ;;  %v486_v39 = vld [vmem:[%s3311_s1 + $0x3d0] sm:$0xff]  ;;  %v2911_v42 = vld [vmem:[%s3313_s3] sm:$0xff] }
  0x2b   : > { %2295 = vmatpush3.bf16.msra.mxu1 %v2294_v53  ;;  %2265 = vmatprep.subr.bf16.mxu0 %v2264_v54  ;;  %v2306_v31 = vpack.c.bf16 %v467_v19, %v466_v18  ;;  %v438_v44 = vld [vmem:[%s3311_s1 + $0x250] sm:$0xff]  ;;  %v439_v47 = vld [vmem:[%s3311_s1 + $0x258] sm:$0xff]  ;;  %v785_v49 = vld [vmem:[%s3314_s4 + $0x8] sm:$0xff]  ;;  %v2312_v50 = vpack.c.bf16 %v487_v40, %v486_v39 }
  0x2c   : > { %2297 = vmatprep.subr.bf16.mxu1 %v2296_v58  ;;  %708 = vmatprep.mubr.f32.mxu0 %v498_v29  ;;  %v470_v48 = vld [vmem:[%s3311_s1 + $0x350] sm:$0xff]  ;;  %v471_v51 = vld [vmem:[%s3311_s1 + $0x358] sm:$0xff]  ;;  %v456_v52 = vld [vmem:[%s3311_s1 + $0x2e0] sm:$0xff]  ;;  %v2282_v56 = vpack.c.bf16 %v439_v47, %v438_v44 }
  0x2d   : > { %778 = vmatprep.mubr.f32.mxu1 %v499_v30  ;;  %822 = vperm.xlu1 %2423, %v784_v41   ;;  %v457_v53 = vld [vmem:[%s3311_s1 + $0x2e8] sm:$0xff]  ;;  %v488_v54 = vld [vmem:[%s3311_s1 + $0x3e0] sm:$0xff]  ;;  %v2314_v58 = vpack.c.bf16 %v471_v51, %v470_v48  ;;  %v490_v3 = vld [vmem:[%s3311_s1 + $0x3f0] sm:$0xff] }
  0x2e   : > { %2267 = vmatpush3.bf16.msra.mxu0 %v2266_v0  ;;  %794 = vperm.xlu0 %2422, %v2911_v42   ;;  %v489_v55 = vld [vmem:[%s3311_s1 + $0x3e8] sm:$0xff]  ;;  %v440_v57 = vld [vmem:[%s3311_s1 + $0x260] sm:$0xff]  ;;  %v2284_v59 = vpack.c.bf16 %v457_v53, %v456_v52  ;;  %v491_v4 = vld [vmem:[%s3311_s1 + $0x3f8] sm:$0xff]  ;;  %v812_v53 = vlaneseq }
  0x2f   : > { %2299 = vmatpush3.bf16.msra.mxu1 %v2298_v1  ;;  %2269 = vmatprep.subr.bf16.mxu0 %v2268_v2  ;;  %v441_v60 = vld [vmem:[%s3311_s1 + $0x268] sm:$0xff]  ;;  %v472_v61 = vld [vmem:[%s3311_s1 + $0x360] sm:$0xff]  ;;  %v2316_v63 = vpack.c.bf16 %v489_v55, %v488_v54  ;;  %v458_v1 = vld [vmem:[%s3311_s1 + $0x2f0] sm:$0xff] }
  0x30   : > { %2301 = vmatprep.subr.bf16.mxu1 %v2300_v6  ;;  %v2953_v62 = vld [vmem:[%s3313_s3 + $0x8] sm:$0xff]  ;;  %v459_v2 = vld [vmem:[%s3311_s1 + $0x2f8] sm:$0xff]  ;;  %v2286_v5 = vpack.c.bf16 %v441_v60, %v440_v57  ;;  %v2481_v6 = vmov 1   ;;  %v442_v10 = vld [vmem:[%s3311_s1 + $0x270] sm:$0xff] }
  0x31   : > { %827 = vperm.xlu1 %2423, %v785_v49   ;;  %v473_v0 = vld [vmem:[%s3311_s1 + $0x368] sm:$0xff]  ;;  %v2975_v7 = vld [vmem:[%s3313_s3 + $0x18] sm:$0xff]  ;;  %v2288_v9 = vpack.c.bf16 %v459_v2, %v458_v1  ;;  %v474_v14 = vld [vmem:[%s3311_s1 + $0x370] sm:$0xff] }
  0x32   : > { %2271 = vmatpush3.bf16.msra.mxu0 %v2270_v13  ;;  %799 = vperm.xlu0 %2422, %v2953_v62   ;;  %v2318_v8 = vpack.c.bf16 %v473_v0, %v472_v61  ;;  %v443_v11 = vld [vmem:[%s3311_s1 + $0x278] sm:$0xff]  ;;  %v2320_v13 = vpack.c.bf16 %v491_v4, %v490_v3  ;;  %v790_v17 = vld [vmem:[%s3313_s3 + $0x10] sm:$0xff]  ;;  %v902_v21 = vld [vmem:[%s3316_s6 + $0x8] sm:$0xff] }
  0x33   : > { %2303 = vmatpush3.bf16.msra.mxu1 %v2302_v15  ;;  %2273 = vmatprep.subr.bf16.mxu0 %v2272_v16  ;;  %v475_v15 = vld [vmem:[%s3311_s1 + $0x378] sm:$0xff]  ;;  %v2290_v16 = vpack.c.bf16 %v443_v11, %v442_v10  ;;  %v786_v18 = vld [vmem:[%s3314_s4 + $0x10] sm:$0xff]  ;;  %v998_v22 = vld [vmem:[%s3318_s8] sm:$0xff] }
  0x34   : > { %2305 = vmatprep.subr.bf16.mxu1 %v2304_v20  ;;  %v2322_v19 = vpack.c.bf16 %v475_v15, %v474_v14  ;;  %v901_v20 = vld [vmem:[%s3316_s6] sm:$0xff]  ;;  %v999_v23 = vld [vmem:[%s3318_s8 + $0x8] sm:$0xff]  ;;  %v903_v28 = vld [vmem:[%s3316_s6 + $0x10] sm:$0xff] }
  0x35   : > { %2424 = vset.pattern.permute.xlu1 %v2481_v6  ;;  %v2325_v24 = vpack.c.bf16 %v902_v21, %v901_v20  ;;  %v904_v29 = vld [vmem:[%s3316_s6 + $0x18] sm:$0xff]  ;;  %v2331_v30 = vpack.c.bf16 %v999_v23, %v998_v22  ;;  %v1979_v4 = vld [vmem:[%s3317_s7] ss:$0 sm:$0xff] }
  0x36   : > { %2275 = vmatpush3.bf16.msra.mxu0 %v2274_v27  ;;  %849 = vperm.xlu1 %2424, %v2953_v62   ;;  %v2482_v27 = vmov 0.0|0.0   ;;  %v2328_v34 = vpack.c.bf16 %v904_v29, %v903_v28 }
  0x37   : > { %2307 = vmatpush3.bf16.msra.mxu1 %v2306_v31  ;;  %2277 = vmatprep.subr.bf16.mxu0 %v2276_v32  ;;  %v1000_v31 = vld [vmem:[%s3318_s8 + $0x10] sm:$0xff]  ;;  %v1001_v32 = vld [vmem:[%s3318_s8 + $0x18] sm:$0xff] }
  0x38   : > { %2309 = vmatprep.subr.bf16.mxu1 %v2308_v36  ;;  %809 = vperm.xlu0 %2422, %v2975_v7   ;;  %v787_v36 = vld [vmem:[%s3314_s4 + $0x18] sm:$0xff] }
  0x3a   : > { %2279 = vmatpush3.bf16.msra.mxu0 %v2278_v43  ;;  %2425 = vset.pattern.permute.xlu1 %v2480_v12 }
  0x3b   : > { %2311 = vmatpush3.bf16.msra.mxu1 %v2310_v45  ;;  %2281 = vmatprep.subr.bf16.mxu0 %v2280_v46 }
  0x3c   : > { %2313 = vmatprep.subr.bf16.mxu1 %v2312_v50  ;;  %804 = vperm.xlu1 %2425, %v790_v17  }
  0x3d   : > { %832 = vperm.xlu0 %2422, %v786_v18  }
  0x3e   : > { %2283 = vmatpush3.bf16.msra.mxu0 %v2282_v56  ;;  %v813_v56 = vshrl.u32 %v812_v53, 7  ;;  %v1160_v53 = vld [vmem:[%s3312_s2 + $0x40] sm:$0xff] }
  0x3f   : > { %2315 = vmatpush3.bf16.msra.mxu1 %v2314_v58  ;;  %2285 = vmatprep.subr.bf16.mxu0 %v2284_v59 }
  0x40   : > { %2317 = vmatprep.subr.bf16.mxu1 %v2316_v63  ;;  %2426 = vset.pattern.permute.xlu1 %v2483_v33  ;;  %v814_v0 = vsub.s32 0, %v813_v56  ;;  %v862_v1 = vsub.s32 1, %v813_v56  ;;  %v890_v3 = vsub.s32 2, %v813_v56  ;;  %v1154_v56 = vld [vmem:[%s3312_s2 + $0x10] sm:$0xff] }
  0x41   : > { %873 = vperm.xlu1 %2426, %v2911_v42   ;;  %2427 = vset.pattern.permute.xlu0 %v2481_v6 }
  0x42   : > { %2287 = vmatpush3.bf16.msra.mxu0 %v2286_v5  ;;  %845 = vperm.xlu0 %2427, %v2911_v42  }
  0x43   : > { %2319 = vmatpush3.bf16.msra.mxu1 %v2318_v8  ;;  %2289 = vmatprep.subr.bf16.mxu0 %v2288_v9 }
  0x44   : > { %2321 = vmatprep.subr.bf16.mxu1 %v2320_v13 }
  0x45   : > { %877 = vperm.xlu1 %2426, %v2953_v62  }
  0x46   : > { %2291 = vmatpush3.bf16.msra.mxu0 %v2290_v16  ;;  %853 = vperm.xlu0 %2427, %v790_v17  }
  0x47   : > { %2323 = vmatpush3.bf16.msra.mxu1 %v2322_v19  ;;  %2324 = vmatprep.subr.bf16.mxu0 %v2482_v27 }
  0x48   : > { %2330 = vmatprep.subr.bf16.mxu1 %v2482_v27 }
  0x49   : > { %709 = vmatmul.mubr.f32.vlgmr.msra.gmra.mrb[2].mxu0 %v2872_v25  ;;  %v2334_v25 = vpack.c.bf16 %v1001_v32, %v1000_v31  ;;  %2428 = vset.pattern.permute.xlu1 %v2480_v12 }
  0x4a   : > { %779 = vmatmul.mubr.f32.vlgmr.msra.gmra.mrb[2].mxu1 %v2875_v26  ;;  %2326 = vmatpush3.bf16.msra.mxu0 %v2325_v24  ;;  %v900_v26 = vld [vmem:[%s3315_s5] sm:$0xff] }
  0x4b   : > { %2327 = vmatprep.subr.bf16.mxu0 %v2482_v27  ;;  %2171 = vmatprep.mubr.msk.f32.mxu0 %vm2484_vm0, %v2485_v35 }
  0x4c   : > { %2332 = vmatpush3.bf16.msra.mxu1 %v2331_v30  ;;  %2182 = vmatprep.mubr.msk.f32.mxu1 %vm2484_vm0, %v2485_v35 }
  0x4d   : > { %2333 = vmatprep.subr.bf16.mxu1 %v2482_v27  ;;  %837 = vperm.xlu1 %2428, %v787_v36  }
  0x4e   : > { %2329 = vmatpush3.bf16.msra.mxu0 %v2328_v34  ;;  %2431 = vset.pattern.permute.xlu0 %v2483_v33 }
  0x4f   : > { %2336 = vmatprep.subr.bf16.mxu0 %v2482_v27  ;;  %885 = vperm.xlu0 %2431, %v2975_v7  }
  0x50   : > { %2335 = vmatpush3.bf16.msra.mxu1 %v2334_v25 }
  0x51   : > { %2172 = vmatmul.mubr.msk.f32.vlgmr.msra.gmra.mrb[4].mxu0 %vm912_vm1, %v900_v26  ;;  %2429 = vset.pattern.permute.xlu1 %v2481_v6 }
  0x52   : > { %2193 = vmatprep.mubr.msk.f32.mxu0 %vm2484_vm0, %v2485_v35  ;;  %857 = vperm.xlu1 %2429, %v2975_v7  }
  0x53   : > { %2183 = vmatmul.mubr.msk.f32.vlgmr.msra.gmra.mrb[4].mxu1 %vm912_vm1, %v900_v26 }
  0x54   : > { %1284 = vmatprep.mubr.f32.mxu1 %v2485_v35 }
  0x56   : > { %2430 = vset.pattern.permute.xlu1 %v2483_v33 }
  0x57   : > { %881 = vperm.xlu1 %2430, %v790_v17  }
  0xac   : > { %v823_v38 = vpop.permute.xlu1 %822 }
  0xad   : > { %v795_v12 = vpop.permute.xlu0 %794 }
  0xb0   : > { %v828_v45 = vpop.permute.xlu1 %827 }
  0xb1   : > { %v800_v47 = vpop.permute.xlu0 %799 }
  0xb5   : > { %v850_v46 = vpop.permute.xlu1 %849 }
  0xb7   : > { %v810_v49 = vpop.permute.xlu0 %809 }
  0xbb   : > { %v805_v48 = vpop.permute.xlu1 %804 }
  0xbc   : > { %v833_v51 = vpop.permute.xlu0 %832 }
  0xc0   : > { %v874_v50 = vpop.permute.xlu1 %873 }
  0xc1   : > { %v846_v55 = vpop.permute.xlu0 %845 }
  0xc4   : > { %v878_v52 = vpop.permute.xlu1 %877 }
  0xc5   : > { %v854_v5 = vpop.permute.xlu0 %853 }
  0xcc   : > { %v838_v59 = vpop.permute.xlu1 %837 }
  0xce   : > { %v886_v33 = vpop.permute.xlu0 %885 }
  0xd1   : > { %v858_v8 = vpop.permute.xlu1 %857 }
  0xd6   : > { %v882_v34 = vpop.permute.xlu1 %881 }
  0xfc   : > { %v2040_v37 = vpop.f32.mrb[0].mxu0 }
  0xfd   : > { %v2075_v39 = vpop.f32.mrb[0].mxu1  ;;  %v2041_v40 = vpop.f32.mrb[1].mxu0 }
  0xfe   : > { %v2042_v41 = vadd.f32 %v2041_v40, %v2040_v37  ;;  %v2076_v42 = vpop.f32.mrb[1].mxu1 }
  0xff   : > { %v2077_v43 = vadd.f32 %v2076_v42, %v2075_v39 }
 0x101   : > { %v641_v44 = vadd.f32 %v2077_v43, %v2042_v41 }
 0x11c   : > { %v2110_v54 = vpop.f32.mrb[2].mxu0 }
 0x11d   : > { %v2111_v57 = vpop.f32.mrb[3].mxu0  ;;  %v2145_v58 = vpop.f32.mrb[2].mxu1 }
 0x11e   : > { %v2112_v60 = vadd.f32 %v2111_v57, %v2110_v54  ;;  %v2146_v61 = vpop.f32.mrb[3].mxu1  ;;  %v1162_v57 = vld [vmem:[%s3312_s2 + $0x50] sm:$0xff] }
 0x11f   : > { %v2147_v62 = vadd.f32 %v2146_v61, %v2145_v58  ;;  %v1169_v58 = vld [vmem:[%s3312_s2 + $0x88] sm:$0xff]  ;;  %v1171_v61 = vld [vmem:[%s3312_s2 + $0x98] sm:$0xff] }
 0x120   : > { %v711_v63 = vadd.f32 %v2112_v60, %v641_v44  ;;  %v1177_v60 = vld [vmem:[%s3312_s2 + $0xc8] sm:$0xff] }
 0x122   : > { %v781_v2 = vadd.f32 %v2147_v62, %v711_v63  ;;  %v1179_v62 = vld [vmem:[%s3312_s2 + $0xd8] sm:$0xff]  ;;  %v2346_v63 = vpack.c.bf16 %v1177_v60, %v1169_v58  ;;  %v1182_v58 = vld [vmem:[%s3312_s2 + $0xf0] sm:$0xff] }
 0x124   : > { %v815_v6 = vrot.slane %v781_v2, %v814_v0  ;;  %v863_v7 = vrot.slane %v781_v2, %v862_v1  ;;  %v982_v9 = vpop.f32.mrb[4].mxu0  ;;  %v891_v15 = vrot.slane %v781_v2, %v890_v3  ;;  %v2362_v0 = vpack.c.bf16 %v1179_v62, %v1171_v61  ;;  %v1168_v1 = vld [vmem:[%s3312_s2 + $0x80] sm:$0xff]  ;;  %v1170_v3 = vld [vmem:[%s3312_s2 + $0x90] sm:$0xff]  ;;  %v1197_v61 = vld [vmem:[%s3312_s2 + $0x168] sm:$0xff] }
 0x125   : > { %v3055_v10 = vadd.f32 %v1979_v4, %v982_v9  ;;  %v2173_v11 = vpop.f32.mrb[5].mxu0  ;;  %v1176_v2 = vld [vmem:[%s3312_s2 + $0xc0] sm:$0xff]  ;;  %v1191_v62 = vld [vmem:[%s3312_s2 + $0x138] sm:$0xff] }
 0x126   : > { %v816_v13 = vmul.f32 %v815_v6, %v795_v12  ;;  %v817_v14 = vmul.f32 %v815_v6, %v800_v47  ;;  %v818_v16 = vmul.f32 %v815_v6, %v805_v48  ;;  %v1075_v17 = vpop.f32.mrb[4].mxu1  ;;  %v866_v18 = vmul.f32 %v863_v7, %v854_v5  ;;  %v1981_v12 = vld [vmem:[%s3319_s9] ss:$0 sm:$0xff]  ;;  %v1153_v48 = vld [vmem:[%s3312_s2 + $0x8] sm:$0xff]  ;;  %v1178_v5 = vld [vmem:[%s3312_s2 + $0xd0] sm:$0xff] }
 0x127   : > { %v819_v19 = vmul.f32 %v815_v6, %v810_v49  ;;  %v2184_v20 = vpop.f32.mrb[5].mxu1  ;;  %v987_v22 = vsel %vm986_vm2, %v3055_v10, -inf  ;;  %v867_v29 = vmul.f32 %v863_v7, %v858_v8  ;;  %v864_v30 = vmul.f32 %v863_v7, %v846_v55  ;;  %v1161_v49 = vld [vmem:[%s3312_s2 + $0x48] sm:$0xff]  ;;  %v1187_v11 = vld [vmem:[%s3312_s2 + $0x118] sm:$0xff] }
 0x128   : > { %v842_v21 = vadd.f32 %v833_v51, %v818_v16  ;;  %v840_v23 = vadd.f32 %v823_v38, %v816_v13  ;;  %v841_v24 = vadd.f32 %v828_v45, %v817_v14  ;;  %988 = vmax.xlane.f32.xlu1 %v987_v22  ;;  %v865_v31 = vmul.f32 %v863_v7, %v850_v46  ;;  %v1163_v51 = vld [vmem:[%s3312_s2 + $0x58] sm:$0xff]  ;;  %v1185_v6 = vld [vmem:[%s3312_s2 + $0x108] sm:$0xff]  ;;  %v1184_v14 = vld [vmem:[%s3312_s2 + $0x100] sm:$0xff] }
 0x129   : > { %v843_v28 = vadd.f32 %v838_v59, %v819_v19  ;;  %v892_v25 = vmul.f32 %v891_v15, %v874_v50  ;;  %v893_v39 = vmul.f32 %v891_v15, %v878_v52  ;;  %v895_v40 = vmul.f32 %v891_v15, %v886_v33  ;;  %v1155_v50 = vld [vmem:[%s3312_s2 + $0x18] sm:$0xff]  ;;  %v1152_v52 = vld [vmem:[%s3312_s2] sm:$0xff]  ;;  %v1193_v7 = vld [vmem:[%s3312_s2 + $0x148] sm:$0xff] }
 0x12a   : > { %v870_v32 = vadd.f32 %v866_v18, %v842_v21  ;;  %v868_v36 = vadd.f32 %v864_v30, %v840_v23  ;;  %v869_v37 = vadd.f32 %v865_v31, %v841_v24  ;;  %v894_v41 = vmul.f32 %v891_v15, %v882_v34  ;;  %v1195_v13 = vld [vmem:[%s3312_s2 + $0x158] sm:$0xff]  ;;  %v1192_v16 = vld [vmem:[%s3312_s2 + $0x140] sm:$0xff]  ;;  %v1194_v18 = vld [vmem:[%s3312_s2 + $0x150] sm:$0xff] }
 0x12b   : > { %v871_v26 = vadd.f32 %v867_v29, %v843_v28  ;;  %v1076_v47 = vadd.f32 %v1981_v12, %v1075_v17  ;;  %v2358_v54 = vpack.c.bf16 %v1163_v51, %v1155_v50  ;;  %v2344_v55 = vpack.c.bf16 %v1160_v53, %v1152_v52  ;;  %v1186_v17 = vld [vmem:[%s3312_s2 + $0x110] sm:$0xff]  ;;  %v1201_v20 = vld [vmem:[%s3312_s2 + $0x188] sm:$0xff]  ;;  %v1203_v22 = vld [vmem:[%s3312_s2 + $0x198] sm:$0xff] }
 0x12c   : > { %v896_v42 = vadd.f32 %v892_v25, %v868_v36  ;;  %v897_v43 = vadd.f32 %v893_v39, %v869_v37  ;;  %v898_v38 = vadd.f32 %v894_v41, %v870_v32  ;;  %v2360_v59 = vpack.c.bf16 %v1162_v57, %v1154_v56  ;;  %v1209_v21 = vld [vmem:[%s3312_s2 + $0x1c8] sm:$0xff]  ;;  %v1211_v28 = vld [vmem:[%s3312_s2 + $0x1d8] sm:$0xff]  ;;  %v1200_v29 = vld [vmem:[%s3312_s2 + $0x180] sm:$0xff] }
 0x12d   : > { %v899_v44 = vadd.f32 %v895_v40, %v871_v26  ;;  %v2348_v4 = vpack.c.bf16 %v1176_v2, %v1168_v1  ;;  %v2364_v8 = vpack.c.bf16 %v1178_v5, %v1170_v3  ;;  %v2350_v9 = vpack.c.bf16 %v1193_v7, %v1185_v6  ;;  %v1208_v30 = vld [vmem:[%s3312_s2 + $0x1c0] sm:$0xff]  ;;  %v1202_v32 = vld [vmem:[%s3312_s2 + $0x190] sm:$0xff]  ;;  %v1157_v26 = vld [vmem:[%s3312_s2 + $0x28] sm:$0xff] }
 0x12e   : > { %v2337_v45 = vpack.c.bf16 %v897_v43, %v896_v42  ;;  %v2366_v15 = vpack.c.bf16 %v1195_v13, %v1187_v11  ;;  %v2352_v19 = vpack.c.bf16 %v1192_v16, %v1184_v14  ;;  %v2368_v23 = vpack.c.bf16 %v1194_v18, %v1186_v17  ;;  %v1210_v33 = vld [vmem:[%s3312_s2 + $0x1d0] sm:$0xff]  ;;  %v1165_v36 = vld [vmem:[%s3312_s2 + $0x68] sm:$0xff]  ;;  %v1159_v37 = vld [vmem:[%s3312_s2 + $0x38] sm:$0xff] }
 0x12f   : > { %v2340_v46 = vpack.c.bf16 %v899_v44, %v898_v38  ;;  %v2354_v24 = vpack.c.bf16 %v1209_v21, %v1201_v20  ;;  %v2370_v31 = vpack.c.bf16 %v1211_v28, %v1203_v22  ;;  %v2356_v34 = vpack.c.bf16 %v1208_v30, %v1200_v29  ;;  %v1167_v40 = vld [vmem:[%s3312_s2 + $0x78] sm:$0xff]  ;;  %v1156_v12 = vld [vmem:[%s3312_s2 + $0x20] sm:$0xff]  ;;  %v1174_v57 = vld [vmem:[%s3312_s2 + $0xb0] sm:$0xff] }
 0x130   : > { %2338 = vmatpush3.bf16.msra.mxu0 %v2337_v45  ;;  %v2372_v25 = vpack.c.bf16 %v1210_v33, %v1202_v32  ;;  %v2374_v39 = vpack.c.bf16 %v1165_v36, %v1157_v26  ;;  %v2390_v41 = vpack.c.bf16 %v1167_v40, %v1159_v37  ;;  %v1175_v50 = vld [vmem:[%s3312_s2 + $0xb8] sm:$0xff]  ;;  %v1172_v53 = vld [vmem:[%s3312_s2 + $0xa0] sm:$0xff]  ;;  %v2396_v2 = vpack.c.bf16 %v1182_v58, %v1174_v57  ;;  %v1190_v7 = vld [vmem:[%s3312_s2 + $0x130] sm:$0xff] }
 0x131   : > { %2339 = vmatprep.subr.bf16.mxu0 %v2482_v27  ;;  %v2342_v27 = vpack.c.bf16 %v1161_v49, %v1153_v48  ;;  %v1173_v48 = vld [vmem:[%s3312_s2 + $0xa8] sm:$0xff]  ;;  %v1188_v3 = vld [vmem:[%s3312_s2 + $0x120] sm:$0xff]  ;;  %v1207_v13 = vld [vmem:[%s3312_s2 + $0x1b8] sm:$0xff] }
 0x132   : > { %v1181_v49 = vld [vmem:[%s3312_s2 + $0xe8] sm:$0xff]  ;;  %v1215_v14 = vld [vmem:[%s3312_s2 + $0x1f8] sm:$0xff]  ;;  %v1204_v17 = vld [vmem:[%s3312_s2 + $0x1a0] sm:$0xff] }
 0x133   : > { %2343 = vmatprep.subr.bf16.mxu1 %v2342_v27  ;;  %v1183_v27 = vld [vmem:[%s3312_s2 + $0xf8] sm:$0xff]  ;;  %v1213_v11 = vld [vmem:[%s3312_s2 + $0x1e8] sm:$0xff]  ;;  %v1212_v20 = vld [vmem:[%s3312_s2 + $0x1e0] sm:$0xff] }
 0x134   : > { %2341 = vmatpush3.bf16.msra.mxu0 %v2340_v46  ;;  %2345 = vmatpush1.bf16.msra.mxu1 %v2344_v55  ;;  %v1164_v46 = vld [vmem:[%s3312_s2 + $0x60] sm:$0xff]  ;;  %v2378_v55 = vpack.c.bf16 %v1181_v49, %v1173_v48  ;;  %v2394_v56 = vpack.c.bf16 %v1183_v27, %v1175_v50  ;;  %v1206_v21 = vld [vmem:[%s3312_s2 + $0x1b0] sm:$0xff] }
 0x135   : > { %2359 = vmatprep.subr.bf16.mxu0 %v2358_v54  ;;  %2347 = vmatprep.subr.bf16.mxu1 %v2346_v63  ;;  %v2376_v51 = vpack.c.bf16 %v1164_v46, %v1156_v12  ;;  %v1180_v54 = vld [vmem:[%s3312_s2 + $0xe0] sm:$0xff]  ;;  %v1199_v63 = vld [vmem:[%s3312_s2 + $0x178] sm:$0xff]  ;;  %v1214_v22 = vld [vmem:[%s3312_s2 + $0x1f0] sm:$0xff] }
 0x136   : > { %v2380_v1 = vpack.c.bf16 %v1180_v54, %v1172_v53  ;;  %v2398_v6 = vpack.c.bf16 %v1199_v63, %v1191_v62 }
 0x137   : > { %2194 = vmatmul.mubr.msk.f32.vlgmr.msra.gmra.mrb[6].mxu0 %vm912_vm1, %v1076_v47  ;;  %v1166_v47 = vld [vmem:[%s3312_s2 + $0x70] sm:$0xff] }
 0x138   : > { %1355 = vmatprep.mubr.f32.mxu0 %v2485_v35  ;;  %2361 = vmatpush1.bf16.msra.mxu0 %v2360_v59  ;;  %v1189_v59 = vld [vmem:[%s3312_s2 + $0x128] sm:$0xff] }
 0x139   : > { %2363 = vmatprep.subr.bf16.mxu0 %v2362_v0  ;;  %2349 = vmatpush1.bf16.msra.mxu1 %v2348_v4  ;;  %v1196_v4 = vld [vmem:[%s3312_s2 + $0x160] sm:$0xff]  ;;  %v2382_v5 = vpack.c.bf16 %v1197_v61, %v1189_v59 }
 0x13a   : > { %2351 = vmatprep.subr.bf16.mxu1 %v2350_v9  ;;  %v1205_v9 = vld [vmem:[%s3312_s2 + $0x1a8] sm:$0xff] }
 0x13b   : > { %v2386_v18 = vpack.c.bf16 %v1213_v11, %v1205_v9 }
 0x13c   : > { %2365 = vmatpush1.bf16.msra.mxu0 %v2364_v8  ;;  %v1198_v8 = vld [vmem:[%s3312_s2 + $0x170] sm:$0xff] }
 0x13d   : > { %2367 = vmatprep.subr.bf16.mxu0 %v2366_v15  ;;  %2353 = vmatpush1.bf16.msra.mxu1 %v2352_v19  ;;  %v2384_v15 = vpack.c.bf16 %v1196_v4, %v1188_v3  ;;  %v2400_v16 = vpack.c.bf16 %v1198_v8, %v1190_v7  ;;  %v2402_v19 = vpack.c.bf16 %v1215_v14, %v1207_v13 }
 0x13e   : > { %2355 = vmatprep.subr.bf16.mxu1 %v2354_v24  ;;  %v2404_v24 = vpack.c.bf16 %v1214_v22, %v1206_v21 }
 0x140   : > { %2369 = vmatpush1.bf16.msra.mxu0 %v2368_v23  ;;  %v2388_v23 = vpack.c.bf16 %v1212_v20, %v1204_v17 }
 0x141   : > { %2371 = vmatprep.subr.bf16.mxu0 %v2370_v31  ;;  %2357 = vmatpush1.bf16.msra.mxu1 %v2356_v34 }
 0x142   : > { %2375 = vmatprep.subr.bf16.mxu1 %v2374_v39 }
 0x144   : > { %2373 = vmatpush1.bf16.msra.mxu0 %v2372_v25 }
 0x145   : > { %2391 = vmatprep.subr.bf16.mxu0 %v2390_v41 }
 0x1b5   : > { %v989_v42 = vpop.xlane.xlu1 %988 }
 0x1b6   : > { %v990_v43 = vsub.f32 %v3055_v10, %v989_v42  ;;  %v1158_v10 = vld [vmem:[%s3312_s2 + $0x30] sm:$0xff] }
 0x1b7   : > { %v2392_v52 = vpack.c.bf16 %v1166_v47, %v1158_v10 }
 0x1b8   : > { %v991_v44 = vmul.f32 1.442695, %v990_v43 }
 0x1ba   : > { %2436 = vpow2.f32 %v991_v44 }
 0x1c4   : > { %v3174_v38 = vpop.eup %2436 }
 0x1c5   : > { %v993_v45 = vsel %vm986_vm2, %v3174_v38, 0.0 }
 0x1c6   : > { %994 = vadd.xlane.f32.xlu0 %v993_v45 }
 0x20a   : > { %v1148_v60 = vpop.f32.mrb[6].mxu0 }
 0x20b   : > { %v2195_v0 = vpop.f32.mrb[7].mxu0  ;;  %1984 = vmatmul.mubr.msk.f32.vlgmr.msra.gmra.mrb[6].mxu1 %vm1216_vm3, %v1148_v60  ;;  %1985 = vmatmul.mubr.msk.f32.vlgmr.msra.gmra.mrb[8].mxu0 %vm1216_vm3, %v1148_v60 }
 0x20c   : > { %2377 = vmatpush1.bf16.msra.mxu1 %v2376_v51  ;;  %2393 = vmatpush1.bf16.msra.mxu0 %v2392_v52 }
 0x20d   : > { %2379 = vmatprep.subr.bf16.mxu1 %v2378_v55  ;;  %2395 = vmatprep.subr.bf16.mxu0 %v2394_v56 }
 0x20e   : > { %1426 = vmatprep.mubr.f32.mxu1 %v2485_v35  ;;  %1497 = vmatprep.mubr.f32.mxu0 %v2485_v35 }
 0x210   : > { %2381 = vmatpush1.bf16.msra.mxu1 %v2380_v1  ;;  %2397 = vmatpush1.bf16.msra.mxu0 %v2396_v2 }
 0x211   : > { %2383 = vmatprep.subr.bf16.mxu1 %v2382_v5  ;;  %2399 = vmatprep.subr.bf16.mxu0 %v2398_v6 }
 0x214   : > { %2385 = vmatpush1.bf16.msra.mxu1 %v2384_v15  ;;  %2401 = vmatpush1.bf16.msra.mxu0 %v2400_v16 }
 0x215   : > { %2387 = vmatprep.subr.bf16.mxu1 %v2386_v18  ;;  %2403 = vmatprep.subr.bf16.mxu0 %v2402_v19 }
 0x218   : > { %2389 = vmatpush1.bf16.msra.mxu1 %v2388_v23  ;;  %2405 = vmatpush1.bf16.msra.mxu0 %v2404_v24 }
 0x21b   : > { %1986 = vmatmul.mubr.msk.f32.vlgmr.msra.gmra.mrb[8].mxu1 %vm1216_vm3, %v1148_v60  ;;  %1987 = vmatmul.mubr.msk.f32.vlgmr.msra.gmra.mrb[10].mxu0 %vm1216_vm3, %v1148_v60 }
 0x21c   : > { %1655 = vmatprep.mubr.f32.mxu1 %v2485_v35  ;;  %1732 = vmatprep.mubr.f32.mxu0 %v2485_v35 }
 0x253   : > { %v995_v28 = vpop.xlane.xlu0 %994 }
 0x254   : > { %2438 = vrcp.f32 %v995_v28 }
 0x25e   : > { %v2439_v29 = vpop.eup %2438 }
 0x25f   : > { %v997_v30 = vmul.f32 %v2439_v29, %v3174_v38 }
 0x261   : > { %1552 = vxpose.xlu1.b32.start.end [1/1] (short) (narrow) %v997_v30, 16 }
 0x2de   : > { %v1286_v31 = vpop.f32.mrb[6].mxu1  ;;  %v1357_v32 = vpop.f32.mrb[8].mxu0 }
 0x2df   : > { %v1988_v33 = vmul.f32 -1.442695, %v1286_v31  ;;  %v1990_v34 = vmul.f32 -1.442695, %v1357_v32  ;;  %v1288_v25 = vpop.f32.mrb[7].mxu1  ;;  %v1359_v26 = vpop.f32.mrb[9].mxu0 }
 0x2e0   : > { %v1989_v36 = vmul.f32 -1.442695, %v1288_v25  ;;  %v1991_v37 = vmul.f32 -1.442695, %v1359_v26 }
 0x2e1   : > { %2440 = vpow2.f32 %v1988_v33  ;;  %v1568_v53 = vpop.trf.xlu1 }
 0x2e2   : > { %2442 = vpow2.f32 %v1990_v34 }
 0x2e3   : > { %2444 = vpow2.f32 %v1989_v36 }
 0x2e4   : > { %2446 = vpow2.f32 %v1991_v37 }
 0x2e5   : > { %v1569_v63 = vpop.trf.xlu1 }
 0x2eb   : > { %v2441_v39 = vpop.eup %2440 }
 0x2ec   : > { %v2443_v40 = vpop.eup %2442  ;;  %v1528_v41 = vadd.f32 1.0, %v2441_v39 }
 0x2ed   : > { %v2445_v42 = vpop.eup %2444  ;;  %v1530_v43 = vadd.f32 1.0, %v2443_v40 }
 0x2ee   : > { %v2447_v44 = vpop.eup %2446  ;;  %2448 = vrcp.f32 %v1528_v41  ;;  %v1529_v38 = vadd.f32 1.0, %v2445_v42  ;;  %v1428_v45 = vpop.f32.mrb[8].mxu1 }
 0x2ef   : > { %v1499_v12 = vpop.f32.mrb[10].mxu0  ;;  %2450 = vrcp.f32 %v1530_v43  ;;  %v1531_v46 = vadd.f32 1.0, %v2447_v44  ;;  %v1992_v10 = vmul.f32 -1.442695, %v1428_v45  ;;  %v1430_v48 = vpop.f32.mrb[9].mxu1 }
 0x2f0   : > { %v1994_v47 = vmul.f32 -1.442695, %v1499_v12  ;;  %2452 = vrcp.f32 %v1529_v38  ;;  %v1993_v49 = vmul.f32 -1.442695, %v1430_v48  ;;  %v1501_v50 = vpop.f32.mrb[11].mxu0 }
 0x2f1   : > { %2454 = vrcp.f32 %v1531_v46  ;;  %v1995_v27 = vmul.f32 -1.442695, %v1501_v50 }
 0x2f2   : > { %2456 = vpow2.f32 %v1992_v10 }
 0x2f3   : > { %2458 = vpow2.f32 %v1994_v47 }
 0x2f4   : > { %2460 = vpow2.f32 %v1993_v49 }
 0x2f5   : > { %2462 = vpow2.f32 %v1995_v27 }
 0x2f8   : > { %v2449_v51 = vpop.eup %2448 }
 0x2f9   : > { %v2451_v52 = vpop.eup %2450 }
 0x2fa   : > { %v2453_v54 = vpop.eup %2452 }
 0x2fb   : > { %v2455_v55 = vpop.eup %2454  ;;  %1591 = vmatprep.subr.mxu1 %v2453_v54 }
 0x2fc   : > { %v2457_v56 = vpop.eup %2456  ;;  %1668 = vmatprep.subr.mxu0 %v2455_v55  ;;  %1592 = vmatpush1.msra.mxu1 %v2449_v51 }
 0x2fd   : > { %v2459_v57 = vpop.eup %2458  ;;  %v1532_v58 = vadd.f32 1.0, %v2457_v56  ;;  %1669 = vmatpush1.msra.mxu0 %v2451_v52  ;;  %2406 = vmatprep.subr.mxu1 %v2455_v55 }
 0x2fe   : > { %v2461_v59 = vpop.eup %2460  ;;  %1996 = vmatmul.mubr.msk.f32.vlgmr.msra.gmra.mrb[10].mxu1 %vm1584_vm4, %v1568_v53  ;;  %1998 = vmatmul.mubr.msk.f32.vlgmr.msra.gmra.mrb[12].mxu0 %vm1584_vm4, %v1568_v53  ;;  %v1534_v61 = vadd.f32 1.0, %v2459_v57 }
 0x2ff   : > { %v2463_v60 = vpop.eup %2462  ;;  %v1533_v62 = vadd.f32 1.0, %v2461_v59  ;;  %2407 = vmatpush1.msra.mxu1 %v2451_v52  ;;  %1661 = vmatprep.mubr.f32.mxu1 %v2485_v35  ;;  %2464 = vrcp.f32 %v1532_v58 }
 0x300   : > { %v1535_v0 = vadd.f32 1.0, %v2463_v60  ;;  %1886 = vmatprep.mubr.f32.mxu0 %v2485_v35 }
 0x301   : > { %2466 = vrcp.f32 %v1533_v62 }
 0x302   : > { %2468 = vrcp.f32 %v1535_v0  ;;  %1997 = vmatmul.mubr.msk.f32.gmra.mrb[12].mxu1 %vm1584_vm4, %v1569_v63 }
 0x303   : > { %2470 = vrcp.f32 %v1534_v61  ;;  %1738 = vmatprep.mubr.f32.mxu1 %v2485_v35 }
 0x306   : > { %1999 = vmatmul.mubr.msk.f32.vlgmr.msra.gmra.mrb[14].mxu1 %vm1584_vm4, %v1569_v63 }
 0x307   : > { %1809 = vmatprep.mubr.f32.mxu1 %v2485_v35 }
 0x309   : > { %v2465_v1 = vpop.eup %2464 }
 0x30b   : > { %v2467_v2 = vpop.eup %2466 }
 0x30c   : > { %v2469_v3 = vpop.eup %2468  ;;  %1745 = vmatprep.subr.mxu1 %v2467_v2 }
 0x30d   : > { %v2471_v4 = vpop.eup %2470  ;;  %1822 = vmatprep.subr.mxu0 %v2469_v3  ;;  %1746 = vmatpush1.msra.mxu1 %v2465_v1 }
 0x30e   : > { %1823 = vmatpush1.msra.mxu0 %v2471_v4  ;;  %2000 = vmatmul.mubr.msk.f32.vlgmr.msra.gmra.mrb[16].mxu1 %vm1584_vm4, %v1568_v53 }
 0x30f   : > { %2002 = vmatmul.mubr.msk.f32.vlgmr.msra.gmra.mrb[14].mxu0 %vm1584_vm4, %v1568_v53  ;;  %1815 = vmatprep.mubr.f32.mxu1 %v2485_v35 }
 0x310   : > { %1892 = vmatprep.mubr.f32.mxu0 %v2485_v35 }
 0x312   : > { %2001 = vmatmul.mubr.msk.f32.gmra.mrb[18].mxu1 %vm1584_vm4, %v1569_v63 }
 0x313   : > { %2003 = vmatmul.mubr.msk.f32.gmra.mrb[16].mxu0 %vm1584_vm4, %v1569_v63 }
 0x3d1   : > { %v1657_v5 = vpop.f32.mrb[10].mxu1  ;;  %v1734_v35 = vpop.f32.mrb[12].mxu0 }
 0x3d2   : > { %1899 = vst [vmem:[%s3289_s20] sm:$0xff] %v1657_v5  ;;  %1901 = vst [vmem:[%s3289_s20 + $0x10] sm:$0xff] %v1734_v35  ;;  %v1659_v6 = vpop.f32.mrb[11].mxu1  ;;  %v1736_v7 = vpop.f32.mrb[13].mxu0 }
 0x3d3   : > { %1900 = vst [vmem:[%s3289_s20 + $0x8] sm:$0xff] %v1659_v6  ;;  %1902 = vst [vmem:[%s3289_s20 + $0x18] sm:$0xff] %v1736_v7 }
 0x3d5   : > { %v1663_v8 = vpop.f32.mrb[12].mxu1 }
 0x3d6   : > { %1907 = vst [vmem:[%s3289_s20 + $0x40] sm:$0xff] %v1663_v8  ;;  %v1665_v9 = vpop.f32.mrb[13].mxu1 }
 0x3d7   : > { %1908 = vst [vmem:[%s3289_s20 + $0x48] sm:$0xff] %v1665_v9 }
 0x3d9   : > { %v1740_v11 = vpop.f32.mrb[14].mxu1 }
 0x3da   : > { %1909 = vst [vmem:[%s3289_s20 + $0x50] sm:$0xff] %v1740_v11  ;;  %v1742_v13 = vpop.f32.mrb[15].mxu1 }
 0x3db   : > { %1910 = vst [vmem:[%s3289_s20 + $0x58] sm:$0xff] %v1742_v13 }
 0x3e1   : > { %v1811_v14 = vpop.f32.mrb[16].mxu1 }
 0x3e2   : > { %1903 = vst [vmem:[%s3289_s20 + $0x20] sm:$0xff] %v1811_v14  ;;  %v1888_v15 = vpop.f32.mrb[14].mxu0  ;;  %v1813_v16 = vpop.f32.mrb[17].mxu1 }
 0x3e3   : > { %1905 = vst [vmem:[%s3289_s20 + $0x30] sm:$0xff] %v1888_v15  ;;  %1904 = vst [vmem:[%s3289_s20 + $0x28] sm:$0xff] %v1813_v16  ;;  %v1890_v17 = vpop.f32.mrb[15].mxu0 }
 0x3e4   : > { %1906 = vst [vmem:[%s3289_s20 + $0x38] sm:$0xff] %v1890_v17 }
 0x3e5   : > { %v1817_v18 = vpop.f32.mrb[18].mxu1 }
 0x3e6   : > { %1911 = vst [vmem:[%s3289_s20 + $0x60] sm:$0xff] %v1817_v18  ;;  %v1894_v19 = vpop.f32.mrb[16].mxu0  ;;  %v1819_v20 = vpop.f32.mrb[19].mxu1 }
 0x3e7   : > { %1913 = vst [vmem:[%s3289_s20 + $0x70] sm:$0xff] %v1894_v19  ;;  %1912 = vst [vmem:[%s3289_s20 + $0x68] sm:$0xff] %v1819_v20  ;;  %v1896_v21 = vpop.f32.mrb[17].mxu0 }
 0x3e8   : > { %1914 = vst [vmem:[%s3289_s20 + $0x78] sm:$0xff] %v1896_v21 }
 0x3e9 PF: > { %s20_s13 = sadd.s32 1, %s2478_s13  }
 0x3ea   : > { %p17_p4 = scmp.ge.s32.totalorder %s20_s13, 4  }
 0x3ec   :  { %19 = sbr.rel (!%p17_p4) target bundleno = 1 (0x1), region = 90 }

</bundles_post_ra>
